<compile_context>
chip_gen: v7x
topology: tpu7x:2x2x1
jax: 0.10.0
libtpu: 0.0.40
codegen_flags: <defaults>
</compile_context>

<pallas_src>
import functools

import jax
import jax.numpy as jnp
from jax.experimental import pallas as pl
from jax.experimental.pallas import tpu as pltpu

IN_DIM = 28 * 28   # 784  (already a multiple of 8; kept unpadded)
H1 = 300
H2 = 100
OUT_DIM = 10

# 128-aligned padded *output* dims of each layer (zero padding, exact).
H1_PAD = 384       # ceil(300/128)*128
H2_PAD = 128       # ceil(100/128)*128
OUT_PAD = 128      # ceil(10/128)*128


def _round_up(v, m):
    return ((v + m - 1) // m) * m


def fashion_mlp_kernel(x_ref, w1_ref, b1_ref, w2_ref, b2_ref, w3_ref, b3_ref,
                       o_ref):
    # All three matmuls + ReLUs fused; weights fully VMEM-resident (~0.73 MiB
    # bf16), only the batch dim is tiled.
    x = x_ref[...].astype(jnp.bfloat16)                          # (tb, 784) f32 -> bf16
    h1 = jnp.dot(x, w1_ref[...],
                 preferred_element_type=jnp.float32) + b1_ref[...]
    h1 = jnp.maximum(h1, 0.0).astype(jnp.bfloat16)               # relu_ -> bf16 for MXU
    h2 = jnp.dot(h1, w2_ref[...],
                 preferred_element_type=jnp.float32) + b2_ref[...]
    h2 = jnp.maximum(h2, 0.0).astype(jnp.bfloat16)               # relu_ -> bf16 for MXU
    y = jnp.dot(h2, w3_ref[...],
                preferred_element_type=jnp.float32) + b3_ref[...]
    o_ref[...] = y.astype(o_ref.dtype)                           # (tb, 128) bf16, lane-dense


def pack_params(params):
    """One-time packing of PyTorch-style params (out,in)/(out,) for the kernel.

    Call once; reuse the result for every forward call (hoisted out of the
    per-call path per perf review).
    """
    def prep_w(w, in_pad, out_pad):
        wt = w.astype(jnp.float32).T                     # (in, out)
        wt = jnp.pad(wt, ((0, in_pad - wt.shape[0]), (0, out_pad - wt.shape[1])))
        return wt.astype(jnp.bfloat16)

    def prep_b(b, out_pad):
        bp = jnp.pad(b.astype(jnp.float32), (0, out_pad - b.shape[0]))
        return bp.reshape(1, out_pad)                    # bias stays f32

    return dict(
        w1t=prep_w(params["w1"], IN_DIM, H1_PAD),        # (784, 384) bf16
        w2t=prep_w(params["w2"], H1_PAD, H2_PAD),        # (384, 128) bf16
        w3t=prep_w(params["w3"], H2_PAD, OUT_PAD),       # (128, 128) bf16
        b1=prep_b(params["b1"], H1_PAD),                 # (1, 384) f32
        b2=prep_b(params["b2"], H2_PAD),                 # (1, 128) f32
        b3=prep_b(params["b3"], OUT_PAD),                # (1, 128) f32
    )


@functools.partial(jax.jit, static_argnames=("tile_b",))
def _forward_impl(xf, packed, tile_b):
    B = xf.shape[0]
    grid = (pl.cdiv(B, tile_b),)                         # last block masked if partial

    # Weights/biases: full copies resident in VMEM, constant index_map.
    full = lambda shape: pl.BlockSpec(shape, lambda i: (0, 0))

    out = pl.pallas_call(
        fashion_mlp_kernel,
        out_shape=jax.ShapeDtypeStruct((B, OUT_PAD), jnp.bfloat16),
        grid_spec=pltpu.PrefetchScalarGridSpec(
            num_scalar_prefetch=0,
            grid=grid,
            in_specs=[
                pl.BlockSpec((tile_b, IN_DIM), lambda i: (i, 0)),  # x tile, f32
                full((IN_DIM, H1_PAD)),    # w1.T
                full((1, H1_PAD)),         # b1
                full((H1_PAD, H2_PAD)),    # w2.T
                full((1, H2_PAD)),         # b2
                full((H2_PAD, OUT_PAD)),   # w3.T
                full((1, OUT_PAD)),        # b3
            ],
            out_specs=pl.BlockSpec((tile_b, OUT_PAD), lambda i: (i, 0)),
        ),
        compiler_params=pltpu.CompilerParams(
            dimension_semantics=("parallel",)),
    )(xf, packed["w1t"], packed["b1"], packed["w2t"], packed["b2"],
      packed["w3t"], packed["b3"])

    # Strip lane padding, return f32 logits (fused into the jit).
    return out[:, :OUT_DIM].astype(jnp.float32)


def fashion_net_forward(x, packed_params, *, tile_b=None):
    """Forward pass of FashionNet.

    x: (B, 28, 28) or (B, 1, 28, 28) or (B, 784) float32
    packed_params: output of pack_params()
    tile_b: batch tile.  Default: min(512, round_up(B, 8)).  On v7x choose a
            tile that leaves >= 2 grid steps so both TensorCores are used.
    returns: (B, 10) float32 logits
    """
    xf = x.reshape(-1, IN_DIM).astype(jnp.float32)
    B = xf.shape[0]
    if tile_b is None:
        tile_b = min(512, _round_up(B, 8))
    tile_b = max(8, _round_up(int(tile_b), 8))
    return _forward_impl(xf, packed_params, tile_b)


def init_params(key):
    """Deterministic init mimicking nn.Linear shapes (out, in) + (out,)."""
    ks = jax.random.split(key, 6)

    def uniform_linear(kw, kb, fan_in, fan_out):
        bound = 1.0 / jnp.sqrt(fan_in)
        w = jax.random.uniform(kw, (fan_out, fan_in), jnp.float32,
                               minval=-bound, maxval=bound)
        b = jax.random.uniform(kb, (fan_out,), jnp.float32,
                               minval=-bound, maxval=bound)
        return w, b

    w1, b1 = uniform_linear(ks[0], ks[1], IN_DIM, H1)
    w2, b2 = uniform_linear(ks[2], ks[3], H1, H2)
    w3, b3 = uniform_linear(ks[4], ks[5], H2, OUT_DIM)
    return dict(w1=w1, b1=b1, w2=w2, b2=b2, w3=w3, b3=b3)


def reference_forward(x, params):
    xf = x.reshape(-1, IN_DIM).astype(jnp.float32)
    h1 = jnp.maximum(xf @ params["w1"].T + params["b1"], 0.0)
    h2 = jnp.maximum(h1 @ params["w2"].T + params["b2"], 0.0)
    return h2 @ params["w3"].T + params["b3"]


if __name__ == "__main__":
    key = jax.random.PRNGKey(0)
    kx, kp = jax.random.split(key)
    params = init_params(kp)
    packed = pack_params(params)   # one-time weight packing (hoisted out of forward)

    # 1) Small-batch latency path: single grid step, tile_b shrinks to 8.
    x_small = jax.random.normal(kx, (8, 28, 28), jnp.float32)
    y_small = jax.block_until_ready(fashion_net_forward(x_small, packed))
    y_small_ref = reference_forward(x_small, params)
    assert y_small.shape == (8, OUT_DIM)
    # bf16 MXU inputs + bf16 output, f32 accumulation -> loosened tolerance.
    assert jnp.allclose(y_small, y_small_ref, atol=3e-2, rtol=3e-2), \
        "small-batch mismatch vs reference"

    # 2) Multi-step grid + masked partial last block (B=300 with tile_b=128).
    x_med = jax.random.normal(jax.random.PRNGKey(1), (300, 1, 28, 28), jnp.float32)
    y_med = jax.block_until_ready(fashion_net_forward(x_med, packed, tile_b=128))
    y_med_ref = reference_forward(x_med, params)
    assert y_med.shape == (300, OUT_DIM)
    assert jnp.allclose(y_med, y_med_ref, atol=3e-2, rtol=3e-2), \
        "partial-block mismatch vs reference"

    print("KERNEL_OK")
</pallas_src>

<mosaic_0001>
module attributes {stable_mosaic.version = 11 : i64} {
  func.func @fashion_mlp_kernel(%arg0: i32, %arg1: memref<8x784xf32, #tpu.memory_space<vmem>>, %arg2: memref<784x384xbf16, #tpu.memory_space<vmem>>, %arg3: memref<1x384xf32, #tpu.memory_space<vmem>>, %arg4: memref<384x128xbf16, #tpu.memory_space<vmem>>, %arg5: memref<1x128xf32, #tpu.memory_space<vmem>>, %arg6: memref<128x128xbf16, #tpu.memory_space<vmem>>, %arg7: memref<1x128xf32, #tpu.memory_space<vmem>>, %arg8: memref<8x128xbf16, #tpu.memory_space<vmem>>) attributes {dimension_semantics = [#tpu.dimension_semantics<parallel>], iteration_bounds = array<i64: 1>, scalar_prefetch = 0 : i64, scratch_operands = 0 : i64, tpu.core_type = #tpu.core_type<tc>, window_params = [{transform_indices = @transform_0, window_bounds = array<i64: 8, 784>}, {pipeline_mode = #tpu.pipeline_mode<synchronous>, transform_indices = @transform_1, window_bounds = array<i64: 784, 384>}, {pipeline_mode = #tpu.pipeline_mode<synchronous>, transform_indices = @transform_2, window_bounds = array<i64: 1, 384>}, {pipeline_mode = #tpu.pipeline_mode<synchronous>, transform_indices = @transform_3, window_bounds = array<i64: 384, 128>}, {pipeline_mode = #tpu.pipeline_mode<synchronous>, transform_indices = @transform_4, window_bounds = array<i64: 1, 128>}, {pipeline_mode = #tpu.pipeline_mode<synchronous>, transform_indices = @transform_5, window_bounds = array<i64: 128, 128>}, {pipeline_mode = #tpu.pipeline_mode<synchronous>, transform_indices = @transform_6, window_bounds = array<i64: 1, 128>}, {transform_indices = @transform_7, window_bounds = array<i64: 8, 128>}]} {
    %c0 = arith.constant 0 : index
    %c0_0 = arith.constant 0 : index
    %0 = vector.load %arg1[%c0, %c0_0] : memref<8x784xf32, #tpu.memory_space<vmem>>, vector<8x784xf32>
    %1 = arith.truncf %0 : vector<8x784xf32> to vector<8x784xbf16>
    %c0_1 = arith.constant 0 : index
    %c0_2 = arith.constant 0 : index
    %2 = vector.load %arg2[%c0_1, %c0_2] : memref<784x384xbf16, #tpu.memory_space<vmem>>, vector<784x384xbf16>
    %cst = arith.constant dense<0.000000e+00> : vector<8x384xf32>
    %3 = tpu.matmul %1, %2, %cst {dimension_numbers = #tpu.dot_dimension_numbers<[1], [0], [0], [1], [0, 0, 1, 1], [], []>} : vector<8x784xbf16>, vector<784x384xbf16>, vector<8x384xf32> -> vector<8x384xf32>
    %c0_3 = arith.constant 0 : index
    %c0_4 = arith.constant 0 : index
    %4 = vector.load %arg3[%c0_3, %c0_4] : memref<1x384xf32, #tpu.memory_space<vmem>>, vector<1x384xf32>
    %5 = vector.broadcast %4 : vector<1x384xf32> to vector<8x384xf32>
    %6 = arith.addf %3, %5 : vector<8x384xf32>
    %cst_5 = arith.constant 0.000000e+00 : f32
    %7 = vector.broadcast %cst_5 : f32 to vector<8x384xf32>
    %8 = arith.maximumf %6, %7 : vector<8x384xf32>
    %9 = arith.truncf %8 : vector<8x384xf32> to vector<8x384xbf16>
    %c0_6 = arith.constant 0 : index
    %c0_7 = arith.constant 0 : index
    %10 = vector.load %arg4[%c0_6, %c0_7] : memref<384x128xbf16, #tpu.memory_space<vmem>>, vector<384x128xbf16>
    %cst_8 = arith.constant dense<0.000000e+00> : vector<8x128xf32>
    %11 = tpu.matmul %9, %10, %cst_8 {dimension_numbers = #tpu.dot_dimension_numbers<[1], [0], [0], [1], [0, 0, 1, 1], [], []>} : vector<8x384xbf16>, vector<384x128xbf16>, vector<8x128xf32> -> vector<8x128xf32>
    %c0_9 = arith.constant 0 : index
    %c0_10 = arith.constant 0 : index
    %12 = vector.load %arg5[%c0_9, %c0_10] : memref<1x128xf32, #tpu.memory_space<vmem>>, vector<1x128xf32>
    %13 = vector.broadcast %12 : vector<1x128xf32> to vector<8x128xf32>
    %14 = arith.addf %11, %13 : vector<8x128xf32>
    %cst_11 = arith.constant 0.000000e+00 : f32
    %15 = vector.broadcast %cst_11 : f32 to vector<8x128xf32>
    %16 = arith.maximumf %14, %15 : vector<8x128xf32>
    %17 = arith.truncf %16 : vector<8x128xf32> to vector<8x128xbf16>
    %c0_12 = arith.constant 0 : index
    %c0_13 = arith.constant 0 : index
    %18 = vector.load %arg6[%c0_12, %c0_13] : memref<128x128xbf16, #tpu.memory_space<vmem>>, vector<128x128xbf16>
    %cst_14 = arith.constant dense<0.000000e+00> : vector<8x128xf32>
    %19 = tpu.matmul %17, %18, %cst_14 {dimension_numbers = #tpu.dot_dimension_numbers<[1], [0], [0], [1], [0, 0, 1, 1], [], []>} : vector<8x128xbf16>, vector<128x128xbf16>, vector<8x128xf32> -> vector<8x128xf32>
    %c0_15 = arith.constant 0 : index
    %c0_16 = arith.constant 0 : index
    %20 = vector.load %arg7[%c0_15, %c0_16] : memref<1x128xf32, #tpu.memory_space<vmem>>, vector<1x128xf32>
    %21 = vector.broadcast %20 : vector<1x128xf32> to vector<8x128xf32>
    %22 = arith.addf %19, %21 : vector<8x128xf32>
    %23 = arith.truncf %22 : vector<8x128xf32> to vector<8x128xbf16>
    %c0_17 = arith.constant 0 : index
    %c0_18 = arith.constant 0 : index
    %24 = vector.load %arg8[%c0_17, %c0_18] : memref<8x128xbf16, #tpu.memory_space<vmem>>, vector<8x128xbf16>
    tpu.vector_store %arg8[%c0_17, %c0_18], %23 {strides = array<i32>} : memref<8x128xbf16, #tpu.memory_space<vmem>>, vector<8x128xbf16>,
    return
  }
  func.func @transform_0(%arg0: i32) -> (i32, i32) {
    %c0_i32 = arith.constant 0 : i32
    %c0_i32_0 = arith.constant 0 : i32
    return %arg0, %c0_i32 : i32, i32
  }
  func.func @transform_1(%arg0: i32) -> (i32, i32) {
    %c0_i32 = arith.constant 0 : i32
    %c0_i32_0 = arith.constant 0 : i32
    %c0_i32_1 = arith.constant 0 : i32
    return %c0_i32, %c0_i32_0 : i32, i32
  }
  func.func @transform_2(%arg0: i32) -> (i32, i32) {
    %c0_i32 = arith.constant 0 : i32
    %c0_i32_0 = arith.constant 0 : i32
    %c0_i32_1 = arith.constant 0 : i32
    return %c0_i32, %c0_i32_0 : i32, i32
  }
  func.func @transform_3(%arg0: i32) -> (i32, i32) {
    %c0_i32 = arith.constant 0 : i32
    %c0_i32_0 = arith.constant 0 : i32
    %c0_i32_1 = arith.constant 0 : i32
    return %c0_i32, %c0_i32_0 : i32, i32
  }
  func.func @transform_4(%arg0: i32) -> (i32, i32) {
    %c0_i32 = arith.constant 0 : i32
    %c0_i32_0 = arith.constant 0 : i32
    %c0_i32_1 = arith.constant 0 : i32
    return %c0_i32, %c0_i32_0 : i32, i32
  }
  func.func @transform_5(%arg0: i32) -> (i32, i32) {
    %c0_i32 = arith.constant 0 : i32
    %c0_i32_0 = arith.constant 0 : i32
    %c0_i32_1 = arith.constant 0 : i32
    return %c0_i32, %c0_i32_0 : i32, i32
  }
  func.func @transform_6(%arg0: i32) -> (i32, i32) {
    %c0_i32 = arith.constant 0 : i32
    %c0_i32_0 = arith.constant 0 : i32
    %c0_i32_1 = arith.constant 0 : i32
    return %c0_i32, %c0_i32_0 : i32, i32
  }
  func.func @transform_7(%arg0: i32) -> (i32, i32) {
    %c0_i32 = arith.constant 0 : i32
    %c0_i32_0 = arith.constant 0 : i32
    return %arg0, %c0_i32 : i32, i32
  }
}

</mosaic_0001>

<bundles_post_ra>
// kernel: _forward_impl.1
= control target key start
LH: loop header
LB: loop body
LE: loop exit
PB: predicated region body
PF: predicated region fallthrough
CT: control target
= control target key end

     0   :  { %12 = vsyncpa [#allocation3], 0  ;;  %s2658_s0 = inlined_call_operand.hbm [shape: f32[8,784], index: 0, kind: input, shape index: {}]   ;;  %s2659_s1 = inlined_call_operand.hbm [shape: bf16[784,384], index: 1, kind: input, shape index: {}]   ;;  %s2660_s2 = inlined_call_operand.vmem [shape: f32[1,384], index: 2, kind: input, shape index: {}]   ;;  %s2661_s3 = inlined_call_operand.hbm [shape: bf16[384,128], index: 3, kind: input, shape index: {}]   ;;  %s2662_s4 = inlined_call_operand.vmem [shape: f32[1,128], index: 4, kind: input, shape index: {}]   ;;  %s2663_s5 = inlined_call_operand.hbm [shape: bf16[128,128], index: 5, kind: input, shape index: {}]   ;;  %s2664_s6 = inlined_call_operand.vmem [shape: f32[1,128], index: 6, kind: input, shape index: {}]   ;;  %s2665_s7 = inlined_call_operand.vmem [shape: bf16[8,128], index: 7, kind: output, shape index: {}]  }
   0x1   :  { %13 = vsyncpa [#allocation5], 0 }
   0x2   :  { %14 = vsyncpa [#allocation8], 0  ;;  %s2510_s24 = smov [#allocation4]   ;;  %s2416_s28 = scalar_lea.hbm %s2659_s1, 18816 }
   0x3   :  { %s30_s25 = sshll.u32 %s2510_s24, 4  ;;  %p2417_p0 = scmp.ne.s32.totalorder %s2659_s1, %s2416_s28  ;;  %s31_s25 = int_to_ptr.vmem [resolvable:$true] %s30_s25 }
   0x4   :  { %p2420_p1 = scmp.lt.u32.totalorder %s2416_s28, %s2659_s1 }
   0x6   :  { %p2422_p2 = pnand %p2420_p1, %p2417_p0 }
   0x8   :  { %2425 = shalt.err (!%p2422_p2)
}
   0x9   :  { %s2426_s10 = scalar_lea.vmem %s31_s25, 18816  ;;  %p2431_p4 = scmp.lt.s32.totalorder %s31_s25, %s31_s25 }
   0xa   :  { %p2427_p3 = scmp.ne.s32.totalorder %s31_s25, %s2426_s10  ;;  %p2432_p5 = scmp.lt.s32.totalorder %s2426_s10, %s2426_s10 }
   0xc   :  { %p2433_p6 = por %p2432_p5, %p2431_p4 }
   0xe   :  { %p2434_p7 = pnand %p2433_p6, %p2427_p3 }
  0x10   :  { %2437 = shalt.err (!%p2434_p7)
}
  0x11   :  { %s2511_s11 = smov 192   ;;  %s2512_s12 = smov 12  }
  0x12   :  { %36 = dma.hbm_to_vmem [thread:$0]  %s2659_s1, 18816, %s31_s25, [#allocation5], %s2511_s11, %s2511_s11, %s2512_s12  }
  0x13   :  { %s2513_s15 = smov [#allocation2]   ;;  %s2514_s17 = smov [#allocation6]  }
  0x14   :  { %s21_s16 = sshll.u32 %s2513_s15, 4  ;;  %s44_s18 = sshll.u32 %s2514_s17, 4  ;;  %s22_s16 = int_to_ptr.vmem [resolvable:$true] %s21_s16  ;;  %s45_s18 = int_to_ptr.vmem [resolvable:$true] %s44_s18 }
  0x15   :  { %s2438_s21 = scalar_lea.hbm %s2658_s0, 896 }
  0x16   :  { %p2439_p8 = scmp.ne.s32.totalorder %s2658_s0, %s2438_s21  ;;  %p2442_p9 = scmp.lt.u32.totalorder %s2438_s21, %s2658_s0 }
  0x18   :  { %p2444_p10 = pnand %p2442_p9, %p2439_p8 }
  0x1a   :  { %2447 = shalt.err (!%p2444_p10)
}
  0x1b   :  { %s2448_s1 = scalar_lea.vmem %s22_s16, 896  ;;  %p2453_p12 = scmp.lt.s32.totalorder %s22_s16, %s22_s16 }
  0x1c   :  { %p2449_p11 = scmp.ne.s32.totalorder %s22_s16, %s2448_s1  ;;  %p2454_p13 = scmp.lt.s32.totalorder %s2448_s1, %s2448_s1 }
  0x1e   :  { %p2455_p0 = por %p2454_p13, %p2453_p12 }
  0x20   :  { %p2456_p1 = pnand %p2455_p0, %p2449_p11 }
  0x22   :  { %2459 = shalt.err (!%p2456_p1)
}
  0x23   :  { %24 = dma.hbm_to_vmem [thread:$0]  %s2658_s0, 896, %s22_s16, [#allocation3]  }
  0x24   :  { %s2460_s30 = scalar_lea.hbm %s2661_s3, 3072 }
  0x25   :  { %p2461_p2 = scmp.ne.s32.totalorder %s2661_s3, %s2460_s30  ;;  %p2464_p3 = scmp.lt.u32.totalorder %s2460_s30, %s2661_s3 }
  0x27   :  { %p2466_p4 = pnand %p2464_p3, %p2461_p2 }
  0x29   :  { %2469 = shalt.err (!%p2466_p4)
}
  0x2a   :  { %s2470_s12 = scalar_lea.vmem %s45_s18, 3072  ;;  %p2475_p6 = scmp.lt.s32.totalorder %s45_s18, %s45_s18 }
  0x2b   :  { %p2471_p5 = scmp.ne.s32.totalorder %s45_s18, %s2470_s12  ;;  %p2476_p7 = scmp.lt.s32.totalorder %s2470_s12, %s2470_s12 }
  0x2d   :  { %p2477_p8 = por %p2476_p7, %p2475_p6 }
  0x2f   :  { %p2478_p9 = pnand %p2477_p8, %p2471_p5 }
  0x31   :  { %2481 = shalt.err (!%p2478_p9)
}
  0x32   :  { %s2515_s0 = smov 64   ;;  %s2516_s13 = smov 4  }
  0x33   :  { %50 = dma.hbm_to_vmem [thread:$0]  %s2661_s3, 3072, %s45_s18, [#allocation5], %s2515_s0, %s2515_s0, %s2516_s13  }
  0x34   :  { %s2517_s16 = smov [#allocation7]   ;;  %s2482_s21 = scalar_lea.hbm %s2663_s5, 1024 }
  0x35   :  { %s58_s17 = sshll.u32 %s2517_s16, 4  ;;  %p2483_p10 = scmp.ne.s32.totalorder %s2663_s5, %s2482_s21  ;;  %s59_s17 = int_to_ptr.vmem [resolvable:$true] %s58_s17 }
  0x36   :  { %p2486_p11 = scmp.lt.u32.totalorder %s2482_s21, %s2663_s5 }
  0x38   :  { %p2488_p12 = pnand %p2486_p11, %p2483_p10 }
  0x3a   :  { %2491 = shalt.err (!%p2488_p12)
}
  0x3b   :  { %s2492_s1 = scalar_lea.vmem %s59_s17, 1024  ;;  %p2497_p0 = scmp.lt.s32.totalorder %s59_s17, %s59_s17 }
  0x3c   :  { %p2493_p13 = scmp.ne.s32.totalorder %s59_s17, %s2492_s1  ;;  %p2498_p1 = scmp.lt.s32.totalorder %s2492_s1, %s2492_s1 }
  0x3e   :  { %p2499_p2 = por %p2498_p1, %p2497_p0 }
  0x40   :  { %p2500_p3 = pnand %p2499_p2, %p2493_p13 }
  0x42   :  { %2503 = shalt.err (!%p2500_p3)
}
  0x43   :  { %64 = dma.hbm_to_vmem [thread:$0]  %s2663_s5, 1024, %s59_s17, [#allocation8], %s2515_s0, %s2515_s0, %s2516_s13  }
  0x44   :  { %2504 = dma.done.wait [#allocation3], 896  }
  0x45   :  { %2505 = vsyncadd [#allocation3], 4294966400 }
  0x46   :  { %2506 = dma.done.wait [#allocation5], 21888  }
  0x47   :  { %2507 = vsyncadd [#allocation5], 4294945408 }
  0x48   :  { %2508 = dma.done.wait [#allocation8], 1024  }
  0x49   :  { %2509 = vsyncadd [#allocation8], 4294966272  ;;  %v2188_v0 = vld [vmem:[#allocation4 + $0x4] ss:$12 sps:$4 sm:$0xff]   ;;  %v2190_v1 = vld [vmem:[#allocation4] ss:$12 sps:$4 sm:$0xff]  }
  0x4a   :  { %1095 = vmatprep.subr.bf16.mxu0 %v2188_v0  ;;  %v2191_v2 = vld [vmem:[#allocation4 + $0x1c] ss:$12 sps:$4 sm:$0xff]   ;;  %v2193_v3 = vld [vmem:[#allocation4 + $0x18] ss:$12 sps:$4 sm:$0xff]   ;;  %v2194_v4 = vld [vmem:[#allocation4 + $0x34] ss:$12 sps:$4 sm:$0xff]  }
  0x4b   :  { %1096 = vmatpush1.bf16.msra.mxu0 %v2190_v1  ;;  %v2196_v5 = vld [vmem:[#allocation4 + $0x30] ss:$12 sps:$4 sm:$0xff]   ;;  %v2197_v6 = vld [vmem:[#allocation4 + $0x4c] ss:$12 sps:$4 sm:$0xff]   ;;  %v2199_v7 = vld [vmem:[#allocation4 + $0x48] ss:$12 sps:$4 sm:$0xff]  }
  0x4c   :  { %1097 = vmatprep.subr.bf16.mxu0 %v2191_v2  ;;  %v2200_v8 = vld [vmem:[#allocation4 + $0x64] ss:$12 sps:$4 sm:$0xff]   ;;  %v2202_v9 = vld [vmem:[#allocation4 + $0x60] ss:$12 sps:$4 sm:$0xff]   ;;  %v2203_v10 = vld [vmem:[#allocation4 + $0x7c] ss:$12 sps:$4 sm:$0xff]  }
  0x4d   :  { %v2205_v11 = vld [vmem:[#allocation4 + $0x78] ss:$12 sps:$4 sm:$0xff]   ;;  %v2206_v12 = vld [vmem:[#allocation4 + $0x94] ss:$12 sps:$4 sm:$0xff]   ;;  %v2208_v15 = vld [vmem:[#allocation4 + $0x90] ss:$12 sps:$4 sm:$0xff]  }
  0x4e   :  { %v81_v13 = vld [vmem:[#allocation2 + $0x8] sm:$0xff]  ;;  %v2209_v16 = vld [vmem:[#allocation4 + $0xac] ss:$12 sps:$4 sm:$0xff]   ;;  %v2215_v24 = vld [vmem:[#allocation4 + $0xdc] ss:$12 sps:$4 sm:$0xff]   ;;  %vm1091_vm0 = vcmask 130048  }
  0x4f   :  { %1098 = vmatpush1.bf16.msra.mxu0 %v2193_v3  ;;  %v88_v14 = vpack.c.bf16 %v81_v13, %v81_v13  ;;  %v2242_v17 = vld [vmem:[#allocation4 + $0xc8] ss:$12 sps:$4 sm:$0xff]   ;;  %v2212_v20 = vld [vmem:[#allocation4 + $0xc4] ss:$12 sps:$4 sm:$0xff]   ;;  %v2247_v21 = vld [vmem:[#allocation4 + $0xe0] ss:$12 sps:$4 sm:$0xff]  }
  0x50   :  { %1099 = vmatprep.subr.bf16.mxu0 %v2194_v4  ;;  %v2243_v18 = vld [vmem:[#allocation4 + $0x8] ss:$12 sps:$4 sm:$0xff]   ;;  %2009 = vmatprep.subr.bf16.mxu1 %v2242_v17  ;;  %v2248_v22 = vld [vmem:[#allocation4 + $0x20] ss:$12 sps:$4 sm:$0xff]   ;;  %v2252_v25 = vld [vmem:[#allocation4 + $0xf8] ss:$12 sps:$4 sm:$0xff]  }
  0x51   :  { %1127 = vmatprep.mubr.bf16.mxu0 %v88_v14  ;;  %1291 = vmatprep.mubr.bf16.mxu1 %v88_v14  ;;  %v2211_v19 = vld [vmem:[#allocation4 + $0xa8] ss:$12 sps:$4 sm:$0xff]   ;;  %v2214_v23 = vld [vmem:[#allocation4 + $0xc0] ss:$12 sps:$4 sm:$0xff]   ;;  %v2253_v26 = vld [vmem:[#allocation4 + $0x38] ss:$12 sps:$4 sm:$0xff]  }
  0x52   :  { %2010 = vmatpush3.bf16.msra.mxu1 %v2243_v18  ;;  %v2217_v27 = vld [vmem:[#allocation4 + $0xd8] ss:$12 sps:$4 sm:$0xff]   ;;  %v2218_v28 = vld [vmem:[#allocation4 + $0xf4] ss:$12 sps:$4 sm:$0xff]   ;;  %v2257_v29 = vld [vmem:[#allocation4 + $0x110] ss:$12 sps:$4 sm:$0xff]  }
  0x53   :  { %1100 = vmatpush1.bf16.msra.mxu0 %v2196_v5  ;;  %2011 = vmatprep.subr.bf16.mxu1 %v2247_v21  ;;  %v2258_v30 = vld [vmem:[#allocation4 + $0x50] ss:$12 sps:$4 sm:$0xff]   ;;  %v2262_v32 = vld [vmem:[#allocation4 + $0x128] ss:$12 sps:$4 sm:$0xff]   ;;  %v2221_v33 = vld [vmem:[#allocation4 + $0x10c] ss:$12 sps:$4 sm:$0xff]  }
  0x54   :  { %1101 = vmatprep.subr.bf16.mxu0 %v2197_v6  ;;  %v2220_v31 = vld [vmem:[#allocation4 + $0xf0] ss:$12 sps:$4 sm:$0xff]   ;;  %v2263_v34 = vld [vmem:[#allocation4 + $0x68] ss:$12 sps:$4 sm:$0xff]   ;;  %v2267_v35 = vld [vmem:[#allocation4 + $0x140] ss:$12 sps:$4 sm:$0xff]  }
  0x55   :  { %v2223_v36 = vld [vmem:[#allocation4 + $0x108] ss:$12 sps:$4 sm:$0xff]   ;;  %v2224_v37 = vld [vmem:[#allocation4 + $0x124] ss:$12 sps:$4 sm:$0xff]   ;;  %v2268_v38 = vld [vmem:[#allocation4 + $0x80] ss:$12 sps:$4 sm:$0xff]  }
  0x56   :  { %2012 = vmatpush3.bf16.msra.mxu1 %v2248_v22  ;;  %v2272_v39 = vld [vmem:[#allocation4 + $0x158] ss:$12 sps:$4 sm:$0xff]   ;;  %v2226_v40 = vld [vmem:[#allocation4 + $0x120] ss:$12 sps:$4 sm:$0xff]   ;;  %v2227_v41 = vld [vmem:[#allocation4 + $0x13c] ss:$12 sps:$4 sm:$0xff]  }
  0x57   :  { %1102 = vmatpush1.bf16.msra.mxu0 %v2199_v7  ;;  %2013 = vmatprep.subr.bf16.mxu1 %v2252_v25  ;;  %v2273_v42 = vld [vmem:[#allocation4 + $0x98] ss:$12 sps:$4 sm:$0xff]   ;;  %v2277_v43 = vld [vmem:[#allocation4 + $0x170] ss:$12 sps:$4 sm:$0xff]   ;;  %v2230_v45 = vld [vmem:[#allocation4 + $0x154] ss:$12 sps:$4 sm:$0xff]  }
  0x58   :  { %1103 = vmatprep.subr.bf16.mxu0 %v2200_v8  ;;  %v2229_v44 = vld [vmem:[#allocation4 + $0x138] ss:$12 sps:$4 sm:$0xff]   ;;  %v2278_v46 = vld [vmem:[#allocation4 + $0xb0] ss:$12 sps:$4 sm:$0xff]   ;;  %v2282_v47 = vld [vmem:[#allocation4 + $0x248] ss:$12 sps:$4 sm:$0xff]  }
  0x59   :  { %v2232_v48 = vld [vmem:[#allocation4 + $0x150] ss:$12 sps:$4 sm:$0xff]   ;;  %v80_v49 = vld [vmem:[#allocation2] sm:$0xff]  ;;  %v2292_v57 = vld [vmem:[#allocation4 + $0x278] ss:$12 sps:$4 sm:$0xff]   ;;  %vm2519_vm1 = vmmov 0  }
  0x5a   :  { %2014 = vmatpush3.bf16.msra.mxu1 %v2253_v26  ;;  %v2233_v50 = vld [vmem:[#allocation4 + $0x16c] ss:$12 sps:$4 sm:$0xff]   ;;  %v2283_v51 = vld [vmem:[#allocation4 + $0x188] ss:$12 sps:$4 sm:$0xff]   ;;  %v87_v52 = vpack.c.bf16 %v80_v49, %v80_v49  ;;  %v2238_v55 = vld [vmem:[#allocation4 + $0x184] ss:$12 sps:$4 sm:$0xff]  }
  0x5b   :  { %1104 = vmatpush1.bf16.msra.mxu0 %v2202_v9  ;;  %2015 = vmatprep.subr.bf16.mxu1 %v2257_v29  ;;  %v2287_v53 = vld [vmem:[#allocation4 + $0x260] ss:$12 sps:$4 sm:$0xff]   ;;  %v2235_v54 = vld [vmem:[#allocation4 + $0x168] ss:$12 sps:$4 sm:$0xff]   ;;  %v2293_v60 = vld [vmem:[#allocation4 + $0x1b8] ss:$12 sps:$4 sm:$0xff]  }
  0x5c   :  { %1105 = vmatprep.subr.bf16.mxu0 %v2203_v10  ;;  %v2288_v56 = vld [vmem:[#allocation4 + $0x1a0] ss:$12 sps:$4 sm:$0xff]   ;;  %v2241_v59 = vld [vmem:[#allocation4 + $0x19c] ss:$12 sps:$4 sm:$0xff]   ;;  %v2239_v62 = vld [vmem:[#allocation4 + $0x198] ss:$12 sps:$4 sm:$0xff]  }
  0x5d   :  { %v2236_v58 = vld [vmem:[#allocation4 + $0x180] ss:$12 sps:$4 sm:$0xff]   ;;  %v2297_v61 = vld [vmem:[#allocation4 + $0x290] ss:$12 sps:$4 sm:$0xff]   ;;  %v2302_v1 = vld [vmem:[#allocation4 + $0x2a8] ss:$12 sps:$4 sm:$0xff]  }
  0x5e   :  { %2016 = vmatpush3.bf16.msra.mxu1 %v2258_v30  ;;  %v2246_v63 = vld [vmem:[#allocation4 + $0x1b4] ss:$12 sps:$4 sm:$0xff]   ;;  %v2298_v0 = vld [vmem:[#allocation4 + $0x1d0] ss:$12 sps:$4 sm:$0xff]   ;;  %v2251_v3 = vld [vmem:[#allocation4 + $0x1cc] ss:$12 sps:$4 sm:$0xff]  }
  0x5f   :  { %1106 = vmatpush1.bf16.msra.mxu0 %v2205_v11  ;;  %2017 = vmatprep.subr.bf16.mxu1 %v2262_v32  ;;  %v2244_v2 = vld [vmem:[#allocation4 + $0x1b0] ss:$12 sps:$4 sm:$0xff]   ;;  %v2303_v4 = vld [vmem:[#allocation4 + $0x1e8] ss:$12 sps:$4 sm:$0xff]   ;;  %v2307_v5 = vld [vmem:[#allocation4 + $0x2c0] ss:$12 sps:$4 sm:$0xff]  }
  0x60   :  { %1107 = vmatprep.subr.bf16.mxu0 %v2206_v12  ;;  %v83_v6 = vld [vmem:[#allocation2 + $0x18] sm:$0xff]  ;;  %v2249_v7 = vld [vmem:[#allocation4 + $0x1c8] ss:$12 sps:$4 sm:$0xff]   ;;  %v2318_v18 = vld [vmem:[#allocation4 + $0x230] ss:$12 sps:$4 sm:$0xff]  }
  0x61   :  { %v90_v8 = vpack.c.bf16 %v83_v6, %v83_v6  ;;  %v2256_v9 = vld [vmem:[#allocation4 + $0x1e4] ss:$12 sps:$4 sm:$0xff]   ;;  %v2308_v10 = vld [vmem:[#allocation4 + $0x200] ss:$12 sps:$4 sm:$0xff]   ;;  %v2261_v13 = vld [vmem:[#allocation4 + $0x1fc] ss:$12 sps:$4 sm:$0xff]  }
  0x62   :  { %2018 = vmatpush3.bf16.msra.mxu1 %v2263_v34  ;;  %v2312_v11 = vld [vmem:[#allocation4 + $0x2d8] ss:$12 sps:$4 sm:$0xff]   ;;  %v2254_v12 = vld [vmem:[#allocation4 + $0x1e0] ss:$12 sps:$4 sm:$0xff]   ;;  %v2264_v21 = vld [vmem:[#allocation4 + $0x210] ss:$12 sps:$4 sm:$0xff]  }
  0x63   :  { %1108 = vmatpush1.bf16.msra.mxu0 %v2208_v15  ;;  %2019 = vmatprep.subr.bf16.mxu1 %v2267_v35  ;;  %v2313_v14 = vld [vmem:[#allocation4 + $0x218] ss:$12 sps:$4 sm:$0xff]   ;;  %v2317_v15 = vld [vmem:[#allocation4 + $0x2f0] ss:$12 sps:$4 sm:$0xff]   ;;  %v2266_v17 = vld [vmem:[#allocation4 + $0x214] ss:$12 sps:$4 sm:$0xff]  }
  0x64   :  { %1109 = vmatprep.subr.bf16.mxu0 %v2209_v16  ;;  %v2259_v16 = vld [vmem:[#allocation4 + $0x1f8] ss:$12 sps:$4 sm:$0xff]   ;;  %v2327_v25 = vld [vmem:[#allocation4 + $0x3e0] ss:$12 sps:$4 sm:$0xff]   ;;  %v2269_v26 = vld [vmem:[#allocation4 + $0x228] ss:$12 sps:$4 sm:$0xff]  }
  0x65   :  { %v2271_v22 = vld [vmem:[#allocation4 + $0x22c] ss:$12 sps:$4 sm:$0xff]   ;;  %v2286_v35 = vld [vmem:[#allocation4 + $0x274] ss:$12 sps:$4 sm:$0xff]   ;;  %v2301_v49 = vld [vmem:[#allocation4 + $0x2bc] ss:$12 sps:$4 sm:$0xff]  }
  0x66   :  { %2020 = vmatpush3.bf16.msra.mxu1 %v2268_v38  ;;  %v2332_v29 = vld [vmem:[#allocation4 + $0x3f8] ss:$12 sps:$4 sm:$0xff]   ;;  %v2274_v30 = vld [vmem:[#allocation4 + $0x240] ss:$12 sps:$4 sm:$0xff]   ;;  %v2284_v38 = vld [vmem:[#allocation4 + $0x270] ss:$12 sps:$4 sm:$0xff]  }
  0x67   :  { %1110 = vmatpush1.bf16.msra.mxu0 %v2211_v19  ;;  %2021 = vmatprep.subr.bf16.mxu1 %v2272_v39  ;;  %v2322_v19 = vld [vmem:[#allocation4 + $0x3c8] ss:$12 sps:$4 sm:$0xff]   ;;  %v2333_v32 = vld [vmem:[#allocation4 + $0x338] ss:$12 sps:$4 sm:$0xff]  }
  0x68   :  { %1111 = vmatprep.subr.bf16.mxu0 %v2212_v20  ;;  %v82_v20 = vld [vmem:[#allocation2 + $0x10] sm:$0xff] }
  0x69   :  { %v2279_v34 = vld [vmem:[#allocation4 + $0x258] ss:$12 sps:$4 sm:$0xff]  }
  0x6a   :  { %2022 = vmatpush3.bf16.msra.mxu1 %v2273_v42  ;;  %v2291_v39 = vld [vmem:[#allocation4 + $0x28c] ss:$12 sps:$4 sm:$0xff]   ;;  %v85_v42 = vld [vmem:[#allocation2 + $0x28] sm:$0xff] }
  0x6b   :  { %1112 = vmatpush1.bf16.msra.mxu0 %v2214_v23  ;;  %2023 = vmatprep.subr.bf16.mxu1 %v2277_v43  ;;  %v2323_v23 = vld [vmem:[#allocation4 + $0x308] ss:$12 sps:$4 sm:$0xff]   ;;  %v2331_v6 = vld [vmem:[#allocation4 + $0x34c] ss:$12 sps:$4 sm:$0xff]  }
  0x6c   :  { %1113 = vmatprep.subr.bf16.mxu0 %v2215_v24  ;;  %v2609_v24 = vpack.c.bf16 %v82_v20, %v82_v20  ;;  %v2289_v43 = vld [vmem:[#allocation4 + $0x288] ss:$12 sps:$4 sm:$0xff]  }
  0x6d   :  { %v2364_v20 = vld [vmem:[#allocation4 + $0x3f4] ss:$12 sps:$4 sm:$0xff]  }
  0x6e   :  { %2024 = vmatpush3.bf16.msra.mxu1 %v2278_v46  ;;  %v2348_v46 = vld [vmem:[#allocation4 + $0x380] ss:$12 sps:$4 sm:$0xff]  }
  0x6f   :  { %1114 = vmatpush1.bf16.msra.mxu0 %v2217_v27  ;;  %2031 = vmatprep.subr.bf16.mxu1 %v2282_v47  ;;  %v2276_v27 = vld [vmem:[#allocation4 + $0x244] ss:$12 sps:$4 sm:$0xff]  }
  0x70   :  { %1115 = vmatprep.subr.bf16.mxu0 %v2218_v28  ;;  %v2328_v28 = vld [vmem:[#allocation4 + $0x320] ss:$12 sps:$4 sm:$0xff]   ;;  %v2352_v47 = vld [vmem:[#allocation4 + $0x458] ss:$12 sps:$4 sm:$0xff]  }
  0x71   :  { %1292 = vmatmul.mubr.bf16.vlgmr.msra.gmra.mrb[0].mxu1 %v87_v52 }
  0x72   :  { %2032 = vmatpush3.bf16.msra.mxu1 %v2283_v51  ;;  %1331 = vmatprep.mubr.bf16.mxu1 %v90_v8  ;;  %v2357_v51 = vld [vmem:[#allocation4 + $0x470] ss:$12 sps:$4 sm:$0xff]  }
  0x73   :  { %1116 = vmatpush1.bf16.msra.mxu0 %v2220_v31  ;;  %2033 = vmatprep.subr.bf16.mxu1 %v2287_v53  ;;  %v2281_v31 = vld [vmem:[#allocation4 + $0x25c] ss:$12 sps:$4 sm:$0xff]   ;;  %v2306_v53 = vld [vmem:[#allocation4 + $0x2d4] ss:$12 sps:$4 sm:$0xff]  }
  0x74   :  { %1117 = vmatprep.subr.bf16.mxu0 %v2221_v33  ;;  %v2337_v33 = vld [vmem:[#allocation4 + $0x410] ss:$12 sps:$4 sm:$0xff]  }
  0x76   :  { %2034 = vmatpush3.bf16.msra.mxu1 %v2288_v56  ;;  %v2304_v56 = vld [vmem:[#allocation4 + $0x2d0] ss:$12 sps:$4 sm:$0xff]  }
  0x77   :  { %1118 = vmatpush1.bf16.msra.mxu0 %v2223_v36  ;;  %2035 = vmatprep.subr.bf16.mxu1 %v2292_v57  ;;  %v2338_v36 = vld [vmem:[#allocation4 + $0x350] ss:$12 sps:$4 sm:$0xff]   ;;  %v2311_v57 = vld [vmem:[#allocation4 + $0x2ec] ss:$12 sps:$4 sm:$0xff]  }
  0x78   :  { %1119 = vmatprep.subr.bf16.mxu0 %v2224_v37  ;;  %v2342_v37 = vld [vmem:[#allocation4 + $0x428] ss:$12 sps:$4 sm:$0xff]  }
  0x7a   :  { %2036 = vmatpush3.bf16.msra.mxu1 %v2293_v60  ;;  %v2309_v60 = vld [vmem:[#allocation4 + $0x2e8] ss:$12 sps:$4 sm:$0xff]  }
  0x7b   :  { %1120 = vmatpush1.bf16.msra.mxu0 %v2226_v40  ;;  %2037 = vmatprep.subr.bf16.mxu1 %v2297_v61  ;;  %v2343_v40 = vld [vmem:[#allocation4 + $0x368] ss:$12 sps:$4 sm:$0xff]   ;;  %v2518_v61 = vmov 0.0  }
  0x7c   :  { %1121 = vmatprep.subr.bf16.mxu0 %v2227_v41  ;;  %v2347_v41 = vld [vmem:[#allocation4 + $0x440] ss:$12 sps:$4 sm:$0xff]  }
  0x7e   :  { %2038 = vmatpush3.bf16.msra.mxu1 %v2298_v0  ;;  %v2314_v0 = vld [vmem:[#allocation4 + $0x300] ss:$12 sps:$4 sm:$0xff]  }
  0x7f   :  { %1122 = vmatpush1.bf16.msra.mxu0 %v2229_v44  ;;  %2039 = vmatprep.subr.bf16.mxu1 %v2302_v1  ;;  %v92_v44 = vpack.c.bf16 %v85_v42, %v85_v42  ;;  %v2321_v1 = vld [vmem:[#allocation4 + $0x31c] ss:$12 sps:$4 sm:$0xff]   ;;  %v2391_v42 = vld [vmem:[#allocation6 + $0x18] sm:$0xff]  }
  0x80   :  { %1123 = vmatprep.subr.bf16.mxu0 %v2230_v45  ;;  %v2296_v45 = vld [vmem:[#allocation4 + $0x2a4] ss:$12 sps:$4 sm:$0xff]  }
  0x82   :  { %2040 = vmatpush3.bf16.msra.mxu1 %v2303_v4  ;;  %v2326_v4 = vld [vmem:[#allocation4 + $0x334] ss:$12 sps:$4 sm:$0xff]  }
  0x83   :  { %1124 = vmatpush1.bf16.msra.mxu0 %v2232_v48  ;;  %2041 = vmatprep.subr.bf16.mxu1 %v2307_v5  ;;  %v2294_v48 = vld [vmem:[#allocation4 + $0x2a0] ss:$12 sps:$4 sm:$0xff]   ;;  %v2324_v5 = vld [vmem:[#allocation4 + $0x330] ss:$12 sps:$4 sm:$0xff]  }
  0x84   :  { %1125 = vmatprep.subr.bf16.mxu0 %v2233_v50  ;;  %v2353_v50 = vld [vmem:[#allocation4 + $0x398] ss:$12 sps:$4 sm:$0xff]  }
  0x86   :  { %2042 = vmatpush3.bf16.msra.mxu1 %v2308_v10  ;;  %v2341_v10 = vld [vmem:[#allocation4 + $0x37c] ss:$12 sps:$4 sm:$0xff]  }
  0x87   :  { %1126 = vmatpush1.bf16.msra.mxu0 %v2235_v54  ;;  %2043 = vmatprep.subr.bf16.mxu1 %v2312_v11  ;;  %v2358_v54 = vld [vmem:[#allocation4 + $0x3b0] ss:$12 sps:$4 sm:$0xff]   ;;  %v2339_v11 = vld [vmem:[#allocation4 + $0x378] ss:$12 sps:$4 sm:$0xff]  }
  0x88   :  { %1136 = vmatprep.subr.bf16.mxu0 %v2238_v55  ;;  %v84_v55 = vld [vmem:[#allocation2 + $0x20] sm:$0xff] }
  0x8a   :  { %1128 = vmatmul.mubr.bf16.vlgmr.msra.gmra.mrb[0].mxu0 %v87_v52  ;;  %2044 = vmatpush3.bf16.msra.mxu1 %v2313_v14  ;;  %v2299_v52 = vld [vmem:[#allocation4 + $0x2b8] ss:$12 sps:$4 sm:$0xff]  }
  0x8b   :  { %1137 = vmatpush1.bf16.msra.mxu0 %v2236_v58  ;;  %1168 = vmatprep.mubr.bf16.mxu0 %v90_v8  ;;  %v2365_v58 = vld [vmem:[#allocation4 + $0x488] ss:$12 sps:$4 sm:$0xff]   ;;  %v2336_v8 = vld [vmem:[#allocation4 + $0x364] ss:$12 sps:$4 sm:$0xff]   ;;  %v2351_v14 = vld [vmem:[#allocation4 + $0x3ac] ss:$12 sps:$4 sm:$0xff]  }
  0x8c   :  { %1138 = vmatprep.subr.bf16.mxu0 %v2241_v59  ;;  %2045 = vmatprep.subr.bf16.mxu1 %v2317_v15  ;;  %v2612_v59 = vpack.c.bf16 %v84_v55, %v84_v55  ;;  %v2349_v15 = vld [vmem:[#allocation4 + $0x3a8] ss:$12 sps:$4 sm:$0xff]  }
  0x8e   :  { %2046 = vmatpush3.bf16.msra.mxu1 %v2318_v18  ;;  %v2361_v18 = vld [vmem:[#allocation4 + $0x3dc] ss:$12 sps:$4 sm:$0xff]  }
  0x8f   :  { %1139 = vmatpush1.bf16.msra.mxu0 %v2239_v62  ;;  %2053 = vmatprep.subr.bf16.mxu1 %v2322_v19  ;;  %v2316_v62 = vld [vmem:[#allocation4 + $0x304] ss:$12 sps:$4 sm:$0xff]  }
  0x90   :  { %1140 = vmatprep.subr.bf16.mxu0 %v2246_v63  ;;  %v86_v63 = vld [vmem:[#allocation2 + $0x30] sm:$0xff] }
  0x91   :  { %1332 = vmatmul.mubr.bf16.vlgmr.msra.gmra.mrb[4].mxu1 %v2609_v24  ;;  %v2359_v19 = vld [vmem:[#allocation4 + $0x3d8] ss:$12 sps:$4 sm:$0xff]  }
  0x92   :  { %2054 = vmatpush3.bf16.msra.mxu1 %v2323_v23  ;;  %1371 = vmatprep.mubr.bf16.mxu1 %v92_v44  ;;  %v2366_v23 = vld [vmem:[#allocation4 + $0x408] ss:$12 sps:$4 sm:$0xff]  }
  0x93   :  { %1141 = vmatpush1.bf16.msra.mxu0 %v2244_v2  ;;  %2055 = vmatprep.subr.bf16.mxu1 %v2327_v25  ;;  %v2618_v2 = vpack.c.bf16 %v86_v63, %v86_v63  ;;  %v2369_v25 = vld [vmem:[#allocation4 + $0x420] ss:$12 sps:$4 sm:$0xff]  }
  0x94   :  { %1142 = vmatprep.subr.bf16.mxu0 %v2251_v3  ;;  %v2319_v3 = vld [vmem:[#allocation4 + $0x318] ss:$12 sps:$4 sm:$0xff]  }
  0x96   :  { %2056 = vmatpush3.bf16.msra.mxu1 %v2328_v28  ;;  %v2377_v28 = vld [vmem:[#allocation4 + $0x454] ss:$12 sps:$4 sm:$0xff]  }
  0x97   :  { %1143 = vmatpush1.bf16.msra.mxu0 %v2249_v7  ;;  %2057 = vmatprep.subr.bf16.mxu1 %v2332_v29  ;;  %v2329_v7 = vld [vmem:[#allocation4 + $0x348] ss:$12 sps:$4 sm:$0xff]   ;;  %v2375_v29 = vld [vmem:[#allocation4 + $0x450] ss:$12 sps:$4 sm:$0xff]  }
  0x98   :  { %1144 = vmatprep.subr.bf16.mxu0 %v2256_v9  ;;  %v2334_v9 = vld [vmem:[#allocation4 + $0x360] ss:$12 sps:$4 sm:$0xff]  }
  0x9a   :  { %2058 = vmatpush3.bf16.msra.mxu1 %v2333_v32  ;;  %v2383_v32 = vld [vmem:[#allocation4 + $0x484] ss:$12 sps:$4 sm:$0xff]  }
  0x9b   :  { %1145 = vmatpush1.bf16.msra.mxu0 %v2254_v12  ;;  %2059 = vmatprep.subr.bf16.mxu1 %v2337_v33  ;;  %v2346_v12 = vld [vmem:[#allocation4 + $0x394] ss:$12 sps:$4 sm:$0xff]  }
  0x9c   :  { %1146 = vmatprep.subr.bf16.mxu0 %v2261_v13  ;;  %v2344_v13 = vld [vmem:[#allocation4 + $0x390] ss:$12 sps:$4 sm:$0xff]   ;;  %v2381_v33 = vld [vmem:[#allocation4 + $0x480] ss:$12 sps:$4 sm:$0xff]  }
  0x9e   :  { %2060 = vmatpush3.bf16.msra.mxu1 %v2338_v36  ;;  %v2385_v36 = vld [vmem:[#allocation6] sm:$0xff]  }
  0x9f   :  { %1147 = vmatpush1.bf16.msra.mxu0 %v2259_v16  ;;  %2061 = vmatprep.subr.bf16.mxu1 %v2342_v37  ;;  %v2356_v16 = vld [vmem:[#allocation4 + $0x3c4] ss:$12 sps:$4 sm:$0xff]  }
  0xa0   :  { %1148 = vmatprep.subr.bf16.mxu0 %v2266_v17  ;;  %v2354_v17 = vld [vmem:[#allocation4 + $0x3c0] ss:$12 sps:$4 sm:$0xff]  }
  0xa1   :  { %v2386_v37 = vld [vmem:[#allocation6 + $0x48] sm:$0xff]  }
  0xa2   :  { %2062 = vmatpush3.bf16.msra.mxu1 %v2343_v40  ;;  %v2389_v40 = vld [vmem:[#allocation6 + $0x10] sm:$0xff]  }
  0xa3   :  { %1149 = vmatpush1.bf16.msra.mxu0 %v2264_v21  ;;  %2063 = vmatprep.subr.bf16.mxu1 %v2347_v41  ;;  %v2362_v21 = vld [vmem:[#allocation4 + $0x3f0] ss:$12 sps:$4 sm:$0xff]  }
  0xa4   :  { %1150 = vmatprep.subr.bf16.mxu0 %v2271_v22  ;;  %v2368_v22 = vld [vmem:[#allocation4 + $0x40c] ss:$12 sps:$4 sm:$0xff]   ;;  %v2390_v41 = vld [vmem:[#allocation6 + $0x58] sm:$0xff]  }
  0xa6   :  { %2064 = vmatpush3.bf16.msra.mxu1 %v2348_v46  ;;  %v2395_v46 = vld [vmem:[#allocation6 + $0x28] sm:$0xff]  }
  0xa7   :  { %1151 = vmatpush1.bf16.msra.mxu0 %v2269_v26  ;;  %2065 = vmatprep.subr.bf16.mxu1 %v2352_v47  ;;  %v2374_v26 = vld [vmem:[#allocation4 + $0x43c] ss:$12 sps:$4 sm:$0xff]  }
  0xa8   :  { %1152 = vmatprep.subr.bf16.mxu0 %v2276_v27  ;;  %v2372_v27 = vld [vmem:[#allocation4 + $0x438] ss:$12 sps:$4 sm:$0xff]  }
  0xaa   :  { %2066 = vmatpush3.bf16.msra.mxu1 %v2353_v50 }
  0xab   :  { %1153 = vmatpush1.bf16.msra.mxu0 %v2274_v30  ;;  %2067 = vmatprep.subr.bf16.mxu1 %v2357_v51  ;;  %v2380_v30 = vld [vmem:[#allocation4 + $0x46c] ss:$12 sps:$4 sm:$0xff]  }
  0xac   :  { %1154 = vmatprep.subr.bf16.mxu0 %v2281_v31  ;;  %v2378_v31 = vld [vmem:[#allocation4 + $0x468] ss:$12 sps:$4 sm:$0xff]  }
  0xae   :  { %2068 = vmatpush3.bf16.msra.mxu1 %v2358_v54  ;;  %v2397_v54 = vld [vmem:[#allocation6 + $0x30] sm:$0xff]  }
  0xaf   :  { %1155 = vmatpush1.bf16.msra.mxu0 %v2279_v34  ;;  %2117 = vmatprep.subr.bf16.mxu1 %v2518_v61  ;;  %v2520_v34 = vmov 0  }
  0xb0   :  { %1156 = vmatprep.subr.bf16.mxu0 %v2286_v35  ;;  %v2384_v35 = vld [vmem:[#allocation6 + $0x40] sm:$0xff]  }
  0xb1   :  { %1372 = vmatmul.mubr.bf16.vlgmr.msra.gmra.mrb[8].mxu1 %v2612_v59 }
  0xb2   :  { %2118 = vmatpush3.bf16.msra.mxu1 %v2365_v58  ;;  %2119 = vmatprep.mubr.msk.bf16.mxu1 %vm2519_vm1, %v2518_v61 }
  0xb3   :  { %1157 = vmatpush1.bf16.msra.mxu0 %v2284_v38  ;;  %2077 = vmatprep.subr.bf16.mxu1 %v2384_v35  ;;  %v2387_v38 = vld [vmem:[#allocation6 + $0x8] sm:$0xff]  }
  0xb4   :  { %1158 = vmatprep.subr.bf16.mxu0 %v2291_v39  ;;  %v2388_v39 = vld [vmem:[#allocation6 + $0x50] sm:$0xff]   ;;  %v2405_v35 = vld [vmem:[#allocation6 + $0xa8] sm:$0xff]  }
  0xb7   :  { %1159 = vmatpush1.bf16.msra.mxu0 %v2289_v43  ;;  %v2392_v43 = vld [vmem:[#allocation6 + $0x60] sm:$0xff]  }
  0xb8   :  { %1160 = vmatprep.subr.bf16.mxu0 %v2296_v45  ;;  %v2394_v45 = vld [vmem:[#allocation6 + $0x68] sm:$0xff]  }
  0xb9   :  { %2120 = vmatmul.mubr.msk.bf16.vlgmr.msra.gmra.mrb[12].mxu1 %vm1091_vm0, %v2618_v2 }
  0xba   :  { %2078 = vmatpush3.bf16.msra.mxu1 %v2385_v36  ;;  %v2406_v36 = vld [vmem:[#allocation6 + $0xb0] sm:$0xff]  }
  0xbb   :  { %1161 = vmatpush1.bf16.msra.mxu0 %v2294_v48  ;;  %2079 = vmatprep.subr.bf16.mxu1 %v2386_v37  ;;  %v2407_v37 = vld [vmem:[#allocation6 + $0xb8] sm:$0xff]  }
  0xbc   :  { %1162 = vmatprep.subr.bf16.mxu0 %v2301_v49 }
  0xbe   :  { %2080 = vmatpush3.bf16.msra.mxu1 %v2387_v38 }
  0xbf   :  { %1163 = vmatpush1.bf16.msra.mxu0 %v2299_v52  ;;  %2081 = vmatprep.subr.bf16.mxu1 %v2388_v39  ;;  %v292_v52 = vlaneseq }
  0xc0   :  { %1164 = vmatprep.subr.bf16.mxu0 %v2306_v53  ;;  %v2396_v53 = vld [vmem:[#allocation6 + $0x70] sm:$0xff]  }
  0xc1   :  { %v293_v55 = vshrl.u32 %v292_v52, 7 }
  0xc2   :  { %2082 = vmatpush3.bf16.msra.mxu1 %v2389_v40  ;;  %v2408_v40 = vld [vmem:[#allocation7] sm:$0xff]  }
  0xc3   :  { %1165 = vmatpush1.bf16.msra.mxu0 %v2304_v56  ;;  %2083 = vmatprep.subr.bf16.mxu1 %v2390_v41  ;;  %v2398_v56 = vld [vmem:[#allocation6 + $0x78] sm:$0xff]   ;;  %v302_v58 = vsub.s32 2, %v293_v55  ;;  %v2409_v41 = vld [vmem:[#allocation7 + $0x8] sm:$0xff]  }
  0xc4   :  { %1166 = vmatprep.subr.bf16.mxu0 %v2311_v57  ;;  %v2399_v57 = vld [vmem:[#allocation6 + $0x38] sm:$0xff]  }
  0xc6   :  { %2084 = vmatpush3.bf16.msra.mxu1 %v2391_v42  ;;  %v2410_v42 = vld [vmem:[#allocation7 + $0x10] sm:$0xff]  }
  0xc7   :  { %1167 = vmatpush1.bf16.msra.mxu0 %v2309_v60  ;;  %2085 = vmatprep.subr.bf16.mxu1 %v2392_v43  ;;  %v2411_v43 = vld [vmem:[#allocation7 + $0x18] sm:$0xff]  }
  0xc8   :  { %1177 = vmatprep.subr.bf16.mxu0 %v2316_v62 }
  0xca   :  { %1169 = vmatmul.mubr.bf16.vlgmr.msra.gmra.mrb[0].mxu0 %v2609_v24  ;;  %v2371_v24 = vld [vmem:[#allocation4 + $0x424] ss:$12 sps:$4 sm:$0xff]  }
  0xcb   :  { %1178 = vmatpush1.bf16.msra.mxu0 %v2314_v0  ;;  %1209 = vmatprep.mubr.bf16.mxu0 %v92_v44  ;;  %v2393_v44 = vld [vmem:[#allocation6 + $0x20] sm:$0xff]  }
  0xcc   :  { %1179 = vmatprep.subr.bf16.mxu0 %v2321_v1  ;;  %2086 = vmatpush3.bf16.msra.mxu1 %v2393_v44  ;;  %v2412_v44 = vld [vmem:[#allocation7 + $0x20] sm:$0xff]  }
  0xcd   :  { %2087 = vmatprep.subr.bf16.mxu1 %v2394_v45  ;;  %v2413_v45 = vld [vmem:[#allocation7 + $0x28] sm:$0xff]  }
  0xcf   :  { %1180 = vmatpush1.bf16.msra.mxu0 %v2319_v3 }
  0xd0   :  { %1181 = vmatprep.subr.bf16.mxu0 %v2326_v4  ;;  %2088 = vmatpush3.bf16.msra.mxu1 %v2395_v46  ;;  %v2414_v46 = vld [vmem:[#allocation7 + $0x30] sm:$0xff]  }
  0xd1   :  { %2089 = vmatprep.subr.bf16.mxu1 %v2396_v53  ;;  %v1975_v53 = vld [vmem:[%s2662_s4] ss:$0 sm:$0xff] }
  0xd3   :  { %1182 = vmatpush1.bf16.msra.mxu0 %v2324_v5 }
  0xd4   :  { %1183 = vmatprep.subr.bf16.mxu0 %v2331_v6  ;;  %2090 = vmatpush3.bf16.msra.mxu1 %v2397_v54 }
  0xd5   :  { %2091 = vmatprep.subr.bf16.mxu1 %v2398_v56 }
  0xd7   :  { %1184 = vmatpush1.bf16.msra.mxu0 %v2329_v7 }
  0xd8   :  { %1185 = vmatprep.subr.bf16.mxu0 %v2336_v8  ;;  %2092 = vmatpush3.bf16.msra.mxu1 %v2399_v57 }
  0xd9   :  { %2123 = vmatprep.subr.bf16.mxu1 %v2518_v61 }
  0xdb   :  { %1186 = vmatpush1.bf16.msra.mxu0 %v2334_v9 }
  0xdc   :  { %1187 = vmatprep.subr.bf16.mxu0 %v2341_v10 }
  0xdf   :  { %1188 = vmatpush1.bf16.msra.mxu0 %v2339_v11 }
  0xe0   :  { %1189 = vmatprep.subr.bf16.mxu0 %v2346_v12 }
  0xe3   :  { %1190 = vmatpush1.bf16.msra.mxu0 %v2344_v13 }
  0xe4   :  { %1191 = vmatprep.subr.bf16.mxu0 %v2351_v14 }
  0xe7   :  { %1192 = vmatpush1.bf16.msra.mxu0 %v2349_v15 }
  0xe8   :  { %1193 = vmatprep.subr.bf16.mxu0 %v2356_v16  ;;  %v294_v16 = vsub.s32 0, %v293_v55 }
  0xeb   :  { %1194 = vmatpush1.bf16.msra.mxu0 %v2354_v17  ;;  %v298_v17 = vsub.s32 1, %v293_v55 }
  0xec   :  { %1195 = vmatprep.subr.bf16.mxu0 %v2361_v18 }
  0xef   :  { %1196 = vmatpush1.bf16.msra.mxu0 %v2359_v19 }
  0xf0   :  { %1197 = vmatprep.subr.bf16.mxu0 %v2364_v20 }
  0xf3   :  { %1198 = vmatpush1.bf16.msra.mxu0 %v2362_v21 }
  0xf4   :  { %1199 = vmatprep.subr.bf16.mxu0 %v2368_v22 }
  0xf7   :  { %1200 = vmatpush1.bf16.msra.mxu0 %v2366_v23 }
  0xf8   :  { %1201 = vmatprep.subr.bf16.mxu0 %v2371_v24 }
  0xfb   :  { %1202 = vmatpush1.bf16.msra.mxu0 %v2369_v25 }
  0xfc   :  { %1203 = vmatprep.subr.bf16.mxu0 %v2374_v26 }
  0xff   :  { %1204 = vmatpush1.bf16.msra.mxu0 %v2372_v27 }
 0x100   :  { %1205 = vmatprep.subr.bf16.mxu0 %v2377_v28 }
 0x103   :  { %1206 = vmatpush1.bf16.msra.mxu0 %v2375_v29  ;;  %v2400_v29 = vld [vmem:[#allocation6 + $0x80] sm:$0xff]  }
 0x104   :  { %1207 = vmatprep.subr.bf16.mxu0 %v2380_v30 }
 0x107   :  { %1208 = vmatpush1.bf16.msra.mxu0 %v2378_v31  ;;  %v2401_v31 = vld [vmem:[#allocation6 + $0x88] sm:$0xff]  }
 0x108   :  { %1218 = vmatprep.subr.bf16.mxu0 %v2383_v32  ;;  %v2402_v32 = vld [vmem:[#allocation6 + $0x90] sm:$0xff]  }
 0x10a   :  { %1210 = vmatmul.mubr.bf16.vlgmr.msra.gmra.mrb[0].mxu0 %v2612_v59  ;;  %v290_v59 = vld [vmem:[%s2660_s2] sm:$0x7] }
 0x10b   :  { %1219 = vmatpush1.bf16.msra.mxu0 %v2381_v33  ;;  %1250 = vmatprep.mubr.bf16.mxu0 %v2520_v34  ;;  %v303_v60 = vrot.slane %v290_v59, %v302_v58  ;;  %v295_v18 = vrot.slane %v290_v59, %v294_v16  ;;  %v299_v19 = vrot.slane %v290_v59, %v298_v17  ;;  %v2403_v33 = vld [vmem:[#allocation6 + $0x98] sm:$0xff]   ;;  %v2404_v34 = vld [vmem:[#allocation6 + $0xa0] sm:$0xff]  }
 0x116   :  { %1973 = vmatmul.mubr.msk.bf16.vlgmr.msra.gmra.mrb[0].mxu0 %vm1091_vm0, %v2618_v2 }
 0x144   :  { %v2025_v47 = vpop.f32.mrb[0].mxu1 }
 0x145   :  { %v2026_v48 = vpop.f32.mrb[1].mxu1 }
 0x146   :  { %v2027_v49 = vadd.f32 %v2026_v48, %v2025_v47  ;;  %v2028_v50 = vpop.f32.mrb[2].mxu1  ;;  %v2415_v47 = vld [vmem:[#allocation7 + $0x38] sm:$0xff]  }
 0x147   :  { %v2029_v51 = vpop.f32.mrb[3].mxu1 }
 0x148   :  { %v1294_v62 = vadd.f32 %v2027_v49, %v303_v60 }
 0x164   :  { %v2047_v63 = vpop.f32.mrb[4].mxu1 }
 0x165   :  { %v2048_v0 = vpop.f32.mrb[5].mxu1 }
 0x166   :  { %v2049_v1 = vadd.f32 %v2048_v0, %v2047_v63  ;;  %v2050_v2 = vpop.f32.mrb[6].mxu1 }
 0x167   :  { %v2051_v3 = vpop.f32.mrb[7].mxu1 }
 0x168   :  { %v1334_v4 = vadd.f32 %v2049_v1, %v1294_v62 }
 0x184   :  { %v2069_v5 = vpop.f32.mrb[8].mxu1 }
 0x185   :  { %v2070_v6 = vpop.f32.mrb[9].mxu1 }
 0x186   :  { %v2071_v7 = vadd.f32 %v2070_v6, %v2069_v5  ;;  %v2072_v8 = vpop.f32.mrb[10].mxu1 }
 0x187   :  { %v2073_v9 = vpop.f32.mrb[11].mxu1 }
 0x188   :  { %v1374_v10 = vadd.f32 %v2071_v7, %v1334_v4 }
 0x18c   :  { %v1413_v11 = vpop.f32.mrb[12].mxu1 }
 0x18d   :  { %v1414_v12 = vadd.f32 %v1413_v11, %v1374_v10  ;;  %v2121_v13 = vpop.f32.mrb[13].mxu1 }
 0x18e   :  { %v1416_v14 = vpop.f32.mrb[14].mxu1 }
 0x18f   :  { %v2122_v15 = vpop.f32.mrb[15].mxu1  ;;  %v1421_v38 = vmax.f32 %v1414_v12, 0.0 }
 0x191   :  { %v1424_v39 = vpack.c.bf16 %v1421_v38, %v1421_v38 }
 0x1e9   :  { %v1252_v20 = vpop.f32.mrb[0].mxu0 }
 0x1ea   :  { %v2163_v21 = vadd.f32 %v1252_v20, %v295_v18  ;;  %v1254_v22 = vpop.f32.mrb[1].mxu0 }
 0x1eb   :  { %v2164_v23 = vadd.f32 %v1254_v22, %v299_v19  ;;  %v1256_v24 = vpop.f32.mrb[2].mxu0 }
 0x1ec   :  { %v1419_v25 = vmax.f32 %v2163_v21, 0.0  ;;  %v1257_v26 = vpop.f32.mrb[3].mxu0 }
 0x1ed   :  { %v1420_v27 = vmax.f32 %v2164_v23, 0.0 }
 0x1ee   :  { %v1422_v30 = vpack.c.bf16 %v1419_v25, %v1419_v25 }
 0x1ef   :  { %v1423_v28 = vpack.c.bf16 %v1420_v27, %v1420_v27 }
 0x1f1   :  { %1656 = vmatprep.mubr.bf16.mxu1 %v1423_v28 }
 0x1f2   :  { %1657 = vmatmul.mubr.bf16.vlgmr.msra.gmra.mrb[16].mxu1 %v1422_v30 }
 0x1f3   :  { %2124 = vmatpush3.bf16.msra.mxu1 %v2400_v29  ;;  %2139 = vmatprep.mubr.msk.bf16.mxu1 %vm2519_vm1, %v2518_v61 }
 0x1f4   :  { %2125 = vmatprep.subr.bf16.mxu1 %v2518_v61 }
 0x1f7   :  { %2126 = vmatpush3.bf16.msra.mxu1 %v2401_v31 }
 0x1f8   :  { %2127 = vmatprep.subr.bf16.mxu1 %v2518_v61 }
 0x1fb   :  { %2128 = vmatpush3.bf16.msra.mxu1 %v2402_v32 }
 0x1fc   :  { %2129 = vmatprep.subr.bf16.mxu1 %v2518_v61 }
 0x1ff   :  { %2130 = vmatpush3.bf16.msra.mxu1 %v2403_v33 }
 0x200   :  { %2131 = vmatprep.subr.bf16.mxu1 %v2518_v61 }
 0x203   :  { %2132 = vmatpush3.bf16.msra.mxu1 %v2404_v34 }
 0x204   :  { %2133 = vmatprep.subr.bf16.mxu1 %v2518_v61 }
 0x207   :  { %2134 = vmatpush3.bf16.msra.mxu1 %v2405_v35 }
 0x208   :  { %2135 = vmatprep.subr.bf16.mxu1 %v2518_v61 }
 0x20b   :  { %2136 = vmatpush3.bf16.msra.mxu1 %v2406_v36 }
 0x20c   :  { %2137 = vmatprep.subr.bf16.mxu1 %v2518_v61 }
 0x20f   :  { %2138 = vmatpush3.bf16.msra.mxu1 %v2407_v37 }
 0x210   :  { %2143 = vmatprep.subr.bf16.mxu1 %v2518_v61 }
 0x212   :  { %2140 = vmatmul.mubr.bf16.vlgmr.msra.gmra.mrb[20].mxu1 %v1424_v39 }
 0x213   :  { %2159 = vmatprep.mubr.msk.bf16.mxu1 %vm2519_vm1, %v2518_v61  ;;  %2144 = vmatpush3.bf16.msra.mxu1 %v2408_v40 }
 0x214   :  { %2145 = vmatprep.subr.bf16.mxu1 %v2518_v61 }
 0x217   :  { %2146 = vmatpush3.bf16.msra.mxu1 %v2409_v41 }
 0x218   :  { %2147 = vmatprep.subr.bf16.mxu1 %v2518_v61 }
 0x21b   :  { %2148 = vmatpush3.bf16.msra.mxu1 %v2410_v42 }
 0x21c   :  { %2149 = vmatprep.subr.bf16.mxu1 %v2518_v61 }
 0x21f   :  { %2150 = vmatpush3.bf16.msra.mxu1 %v2411_v43 }
 0x220   :  { %2151 = vmatprep.subr.bf16.mxu1 %v2518_v61 }
 0x223   :  { %2152 = vmatpush3.bf16.msra.mxu1 %v2412_v44 }
 0x224   :  { %2153 = vmatprep.subr.bf16.mxu1 %v2518_v61 }
 0x227   :  { %2154 = vmatpush3.bf16.msra.mxu1 %v2413_v45 }
 0x228   :  { %2155 = vmatprep.subr.bf16.mxu1 %v2518_v61 }
 0x22b   :  { %2156 = vmatpush3.bf16.msra.mxu1 %v2414_v46 }
 0x22c   :  { %2157 = vmatprep.subr.bf16.mxu1 %v2518_v61  ;;  %v2000_v61 = vld [vmem:[%s2664_s6] ss:$0 sm:$0xff] }
 0x22f   :  { %2158 = vmatpush3.bf16.msra.mxu1 %v2415_v47 }
 0x2c5   :  { %v2093_v48 = vpop.f32.mrb[16].mxu1 }
 0x2c6   :  { %v2094_v49 = vpop.f32.mrb[17].mxu1 }
 0x2c7   :  { %v2095_v50 = vadd.f32 %v2094_v49, %v2093_v48  ;;  %v2096_v51 = vpop.f32.mrb[18].mxu1 }
 0x2c8   :  { %v2097_v52 = vpop.f32.mrb[19].mxu1 }
 0x2c9   :  { %v1659_v54 = vadd.f32 %v2095_v50, %v1975_v53 }
 0x2e5   :  { %v1698_v55 = vpop.f32.mrb[20].mxu1 }
 0x2e6   :  { %v1699_v56 = vadd.f32 %v1698_v55, %v1659_v54  ;;  %v2141_v57 = vpop.f32.mrb[21].mxu1 }
 0x2e7   :  { %v1701_v58 = vpop.f32.mrb[22].mxu1 }
 0x2e8   :  { %v1704_v59 = vmax.f32 %v1699_v56, 0.0  ;;  %v2142_v60 = vpop.f32.mrb[23].mxu1 }
 0x2ea   :  { %v1705_v62 = vpack.c.bf16 %v1704_v59, %v1704_v59 }
 0x2ec   :  { %2160 = vmatmul.mubr.bf16.vlgmr.msra.gmra.mrb[24].mxu1 %v1705_v62 }
 0x3bf   :  { %v1811_v63 = vpop.f32.mrb[24].mxu1 }
 0x3c0   :  { %v1812_v0 = vadd.f32 %v2000_v61, %v1811_v63  ;;  %v2161_v1 = vpop.f32.mrb[25].mxu1 }
 0x3c1   :  { %v1814_v2 = vpop.f32.mrb[26].mxu1 }
 0x3c2   :  { %v1817_v3 = vpack.c.bf16 %v1812_v0, %v1812_v0  ;;  %v2162_v4 = vpop.f32.mrb[27].mxu1 }
 0x3c4   :  { %1818 = vst [vmem:[%s2665_s7] sm:$0xf] %v1817_v3 }
 0x3c5   :  { %1823 = vsyncpa [#allocation3], 1 }
 0x3c6   :  { %1824 = vsyncpa [#allocation5], 1 }
 0x3c7   :  { %1825 = vsyncpa [#allocation8], 1 }

</bundles_post_ra>
